<compile_context>
chip_gen: v5e
topology: v5e:2x2
jax: 0.10.0
libtpu: 0.0.40
codegen_flags: <defaults>
</compile_context>

<pallas_src>
import jax
import jax.numpy as jnp
from jax.experimental import pallas as pl
from jax.experimental.pallas import tpu as pltpu

PAD = 128  # zero pad on each side of the flattened spatial axis; >= W+1, multiple of 128


def make_projnetx_kernel(T, H, W, C, B, SUB):
    HW = H * W
    BC = B * C
    PADW = PAD + HW + PAD

    def kernel(x_ref, w1_ref, b1_ref, w2_ref, b2_ref, out_ref, pad_ref):
        # x_ref/out_ref: (1, B*C, HW) planar; images stacked on the sublane axis.
        # w*_ref: (T, B*C, 9*SUB) block-diagonal im2col matmul matrices.
        # b*_ref: (T, B*C, 1).
        # pad_ref: persistent VMEM scratch (SUB, PAD+HW+PAD); padded flat image.
        X = x_ref[0]                                              # (BC, HW) f32

        # Zero scratch once per grid step: pads and sublane-pad rows stay zero;
        # only the centre HW columns of rows [:BC] are rewritten per conv.
        pad_ref[...] = jnp.zeros((SUB, PADW), jnp.float32)

        # Column-edge masks (lane-only, identical for every stacked image). Hoisted.
        wcol = jax.lax.broadcasted_iota(jnp.int32, (SUB, HW), 1) % W
        not_left = wcol != 0            # column w-1 exists
        not_right = wcol != (W - 1)     # column w+1 exists

        def conv3x3(x, w_ref, b_ref, t):
            # Stage x into the centre of the padded scratch (lane-aligned store),
            # then read each 3x3 tap as a static (SUB, HW) window.  Row over/under
            # flow falls into the zero pads, so only the two column masks remain.
            pad_ref[:BC, PAD:PAD + HW] = x
            taps = []
            for dy in (-1, 0, 1):
                for dx in (-1, 0, 1):
                    s = PAD + dy * W + dx                          # static offset
                    win = pad_ref[:, s:s + HW]                     # (SUB, HW)
                    if dx == -1:
                        win = jnp.where(not_left, win, 0.0)
                    elif dx == 1:
                        win = jnp.where(not_right, win, 0.0)
                    taps.append(win)
            patch = jnp.concatenate(taps, axis=0)                  # (9*SUB, HW) im2col
            y = jnp.dot(w_ref[t], patch,                           # one MXU matmul
                        preferred_element_type=jnp.float32)        # (BC, HW)
            return y + b_ref[t]                                    # (BC,1) bias bcast

        # T=2 -> static unroll is fine; for large T switch to
        # lax.fori_loop(..., unroll=True) with dynamic w_ref[t]/b_ref[t] indexing.
        for t in range(T):
            y = jnp.maximum(conv3x3(X, w1_ref, b1_ref, t), 0.0)    # Conv -> ReLU
            X = X + conv3x3(y, w2_ref, b2_ref, t)                  # Conv -> residual

        out_ref[0] = X                                             # lane-dense store

    return kernel


def _pack_weights(w, B, SUB):
    """w: (T, 3, 3, Cin, Cout) HWIO -> block-diagonal (T, B*C, 9*SUB) matmul matrix.

    Patch row layout per tap k is (image b, cin) padded with zeros up to SUB rows,
    so the packed column index is k*SUB + b*C + cin and the output row is b*C + cout.
    """
    T = w.shape[0]
    C = w.shape[3]
    w4 = jnp.transpose(w.reshape(T, 9, C, C), (0, 3, 1, 2))        # (T, cout, k, cin)
    wp = jnp.zeros((T, B * C, 9, SUB), w.dtype)
    for b in range(B):
        wp = wp.at[:, b * C:(b + 1) * C, :, b * C:(b + 1) * C].set(w4)
    return wp.reshape(T, B * C, 9 * SUB)


def _pack_bias(b, B):
    """b: (T, C) -> (T, B*C, 1) replicated across the B stacked images."""
    T, C = b.shape
    return jnp.tile(b[:, None, :], (1, B, 1)).reshape(T, B * C, 1)


def projnetx_forward(x_nchw, w1, b1, w2, b2, images_per_step=None):
    """x_nchw: (N, C, H, W); w*: (T, 3, 3, Cin, Cout) HWIO per block; b*: (T, C)."""
    N, C, H, W = x_nchw.shape
    T = w1.shape[0]
    HW = H * W
    assert PAD >= W + 1

    if images_per_step is None:
        # Pack 2 images onto sublanes (8-dense at C=4) when that still leaves
        # >= 2 grid steps (keeps both v7x TensorCores busy); otherwise 1.
        # On single-TC v5e/v6e this can be raised (4-8) to amortize per-step cost.
        images_per_step = 2 if (N % 2 == 0 and N >= 4) else 1
    B = images_per_step
    assert N % B == 0, "batch must be divisible by images_per_step"
    BC = B * C
    SUB = -(-BC // 8) * 8            # per-tap sublane group, multiple of 8

    x = x_nchw.reshape(N // B, BC, HW)          # pure reshape; images stack on sublanes
    w1m = _pack_weights(w1, B, SUB)
    w2m = _pack_weights(w2, B, SUB)
    b1c = _pack_bias(b1, B)
    b2c = _pack_bias(b2, B)

    kernel = make_projnetx_kernel(T, H, W, C, B, SUB)
    out = pl.pallas_call(
        kernel,
        out_shape=jax.ShapeDtypeStruct((N // B, BC, HW), jnp.float32),
        grid_spec=pltpu.PrefetchScalarGridSpec(
            num_scalar_prefetch=0,
            grid=(N // B,),
            in_specs=[
                pl.BlockSpec((1, BC, HW), lambda n: (n, 0, 0)),
                pl.BlockSpec((T, BC, 9 * SUB), lambda n: (0, 0, 0)),
                pl.BlockSpec((T, BC, 1), lambda n: (0, 0, 0)),
                pl.BlockSpec((T, BC, 9 * SUB), lambda n: (0, 0, 0)),
                pl.BlockSpec((T, BC, 1), lambda n: (0, 0, 0)),
            ],
            out_specs=pl.BlockSpec((1, BC, HW), lambda n: (n, 0, 0)),
            scratch_shapes=[pltpu.VMEM((SUB, PAD + HW + PAD), jnp.float32)],
        ),
        compiler_params=pltpu.CompilerParams(
            dimension_semantics=("parallel",)),
    )(x, w1m, b1c, w2m, b2c)

    return out.reshape(N, C, H, W)


def projnetx_reference(x_nchw, w1, b1, w2, b2):
    """Pure-JAX reference (matches the PyTorch forward)."""
    x = jnp.transpose(x_nchw, (0, 2, 3, 1))
    dn = jax.lax.conv_dimension_numbers(x.shape, w1[0].shape, ("NHWC", "HWIO", "NHWC"))
    X = x
    for t in range(w1.shape[0]):
        y = jax.lax.conv_general_dilated(X, w1[t], (1, 1), "SAME",
                                         dimension_numbers=dn) + b1[t]
        y = jax.nn.relu(y)
        z = jax.lax.conv_general_dilated(y, w2[t], (1, 1), "SAME",
                                         dimension_numbers=dn) + b2[t]
        X = X + z
    return jnp.transpose(X, (0, 3, 1, 2))


if __name__ == "__main__":
    # Small shapes consistent with the module: channel=4, T=2, 16x16 spatial.
    C, H, W, T = 4, 16, 16, 2

    key = jax.random.PRNGKey(0)
    k_x, k_w1, k_b1, k_w2, k_b2 = jax.random.split(key, 5)
    # Conv weights stored in HWIO (kh, kw, Cin, Cout) per residual block.
    w1 = 0.1 * jax.random.normal(k_w1, (T, 3, 3, C, C), jnp.float32)
    b1 = 0.1 * jax.random.normal(k_b1, (T, C), jnp.float32)
    w2 = 0.1 * jax.random.normal(k_w2, (T, 3, 3, C, C), jnp.float32)
    b2 = 0.1 * jax.random.normal(k_b2, (T, C), jnp.float32)

    # N=4 exercises the packed path (B=2, grid of 2 steps -> both v7x TCs busy);
    # N=2 exercises the B=1 fallback (one image per core on v7x).
    for N in (4, 2):
        x = jax.random.normal(jax.random.fold_in(k_x, N), (N, C, H, W), jnp.float32)
        out = jax.block_until_ready(projnetx_forward(x, w1, b1, w2, b2))
        ref = projnetx_reference(x, w1, b1, w2, b2)
        assert out.shape == ref.shape == (N, C, H, W)
        assert jnp.allclose(out, ref, atol=1e-3, rtol=1e-3), f"mismatch vs reference at N={N}"

    print("KERNEL_OK")
</pallas_src>

<mosaic_0001>
module attributes {stable_mosaic.version = 11 : i64} {
  func.func @kernel(%arg0: i32, %arg1: memref<1x8x256xf32, #tpu.memory_space<vmem>>, %arg2: memref<2x8x72xf32, #tpu.memory_space<vmem>>, %arg3: memref<2x8x1xf32, #tpu.memory_space<vmem>>, %arg4: memref<2x8x72xf32, #tpu.memory_space<vmem>>, %arg5: memref<2x8x1xf32, #tpu.memory_space<vmem>>, %arg6: memref<1x8x256xf32, #tpu.memory_space<vmem>>, %arg7: memref<8x512xf32, #tpu.memory_space<vmem>>) attributes {dimension_semantics = [#tpu.dimension_semantics<parallel>], iteration_bounds = array<i64: 2>, scalar_prefetch = 0 : i64, scratch_operands = 1 : i64, tpu.core_type = #tpu.core_type<tc>, window_params = [{transform_indices = @transform_0, window_bounds = array<i64: 1, 8, 256>}, {pipeline_mode = #tpu.pipeline_mode<synchronous>, transform_indices = @transform_1, window_bounds = array<i64: 2, 8, 72>}, {pipeline_mode = #tpu.pipeline_mode<synchronous>, transform_indices = @transform_2, window_bounds = array<i64: 2, 8, 1>}, {pipeline_mode = #tpu.pipeline_mode<synchronous>, transform_indices = @transform_3, window_bounds = array<i64: 2, 8, 72>}, {pipeline_mode = #tpu.pipeline_mode<synchronous>, transform_indices = @transform_4, window_bounds = array<i64: 2, 8, 1>}, {transform_indices = @transform_5, window_bounds = array<i64: 1, 8, 256>}]} {
    %c0 = arith.constant 0 : index
    %c0_0 = arith.constant 0 : index
    %c0_1 = arith.constant 0 : index
    %0 = vector.load %arg1[%c0, %c0_0, %c0_1] : memref<1x8x256xf32, #tpu.memory_space<vmem>>, vector<1x8x256xf32>
    %1 = vector.shape_cast %0 : vector<1x8x256xf32> to vector<8x256xf32>
    %cst = arith.constant 0.000000e+00 : f32
    %2 = vector.broadcast %cst : f32 to vector<8x512xf32>
    %c0_2 = arith.constant 0 : index
    %c0_3 = arith.constant 0 : index
    %3 = vector.load %arg7[%c0_2, %c0_3] : memref<8x512xf32, #tpu.memory_space<vmem>>, vector<8x512xf32>
    tpu.vector_store %arg7[%c0_2, %c0_3], %2 {strides = array<i32>} : memref<8x512xf32, #tpu.memory_space<vmem>>, vector<8x512xf32>,
    %4 = tpu.iota {dimensions = array<i32: 1>} : vector<8x256xi32>
    %c16_i32 = arith.constant 16 : i32
    %c0_i32 = arith.constant 0 : i32
    %5 = arith.cmpi eq, %c16_i32, %c0_i32 : i32
    %c1_i32 = arith.constant 1 : i32
    %6 = arith.select %5, %c1_i32, %c16_i32 : i32
    %7 = vector.broadcast %6 : i32 to vector<8x256xi32>
    %8 = arith.remsi %4, %7 : vector<8x256xi32>
    %c0_i32_4 = arith.constant 0 : i32
    %9 = vector.broadcast %c0_i32_4 : i32 to vector<8x256xi32>
    %10 = arith.cmpi ne, %8, %9 : vector<8x256xi32>
    %c0_i32_5 = arith.constant 0 : i32
    %11 = vector.broadcast %c0_i32_5 : i32 to vector<8x256xi32>
    %12 = arith.cmpi slt, %8, %11 : vector<8x256xi32>
    %c0_i32_6 = arith.constant 0 : i32
    %13 = arith.cmpi slt, %6, %c0_i32_6 : i32
    %14 = vector.broadcast %13 : i1 to vector<8x256xi1>
    %15 = vector.broadcast %14 : vector<8x256xi1> to vector<8x256xi1>
    %16 = arith.xori %12, %15 : vector<8x256xi1>
    %17 = arith.andi %16, %10 : vector<8x256xi1>
    %18 = vector.broadcast %6 : i32 to vector<8x256xi32>
    %19 = arith.addi %8, %18 : vector<8x256xi32>
    %20 = arith.select %17, %19, %8 : vector<8x256xi1>, vector<8x256xi32>
    %c0_i32_7 = arith.constant 0 : i32
    %21 = vector.broadcast %c0_i32_7 : i32 to vector<8x256xi32>
    %22 = arith.cmpi ne, %20, %21 : vector<8x256xi32>
    %c15_i32 = arith.constant 15 : i32
    %23 = vector.broadcast %c15_i32 : i32 to vector<8x256xi32>
    %24 = arith.cmpi ne, %20, %23 : vector<8x256xi32>
    %c0_8 = arith.constant 0 : index
    %c128 = arith.constant 128 : index
    %25 = vector.load %arg7[%c0_8, %c128] : memref<8x512xf32, #tpu.memory_space<vmem>>, vector<8x256xf32>
    tpu.vector_store %arg7[%c0_8, %c128], %1 {strides = array<i32>} : memref<8x512xf32, #tpu.memory_space<vmem>>, vector<8x256xf32>,
    %c0_9 = arith.constant 0 : index
    %c111 = arith.constant 111 : index
    %26 = vector.load %arg7[%c0_9, %c111] : memref<8x512xf32, #tpu.memory_space<vmem>>, vector<8x256xf32>
    %cst_10 = arith.constant 0.000000e+00 : f32
    %27 = vector.broadcast %cst_10 : f32 to vector<8x256xf32>
    %28 = arith.select %22, %26, %27 : vector<8x256xi1>, vector<8x256xf32>
    %c0_11 = arith.constant 0 : index
    %c112 = arith.constant 112 : index
    %29 = vector.load %arg7[%c0_11, %c112] : memref<8x512xf32, #tpu.memory_space<vmem>>, vector<8x256xf32>
    %c0_12 = arith.constant 0 : index
    %c113 = arith.constant 113 : index
    %30 = vector.load %arg7[%c0_12, %c113] : memref<8x512xf32, #tpu.memory_space<vmem>>, vector<8x256xf32>
    %cst_13 = arith.constant 0.000000e+00 : f32
    %31 = vector.broadcast %cst_13 : f32 to vector<8x256xf32>
    %32 = arith.select %24, %30, %31 : vector<8x256xi1>, vector<8x256xf32>
    %c0_14 = arith.constant 0 : index
    %c127 = arith.constant 127 : index
    %33 = vector.load %arg7[%c0_14, %c127] : memref<8x512xf32, #tpu.memory_space<vmem>>, vector<8x256xf32>
    %cst_15 = arith.constant 0.000000e+00 : f32
    %34 = vector.broadcast %cst_15 : f32 to vector<8x256xf32>
    %35 = arith.select %22, %33, %34 : vector<8x256xi1>, vector<8x256xf32>
    %c0_16 = arith.constant 0 : index
    %c128_17 = arith.constant 128 : index
    %36 = vector.load %arg7[%c0_16, %c128_17] : memref<8x512xf32, #tpu.memory_space<vmem>>, vector<8x256xf32>
    %c0_18 = arith.constant 0 : index
    %c129 = arith.constant 129 : index
    %37 = vector.load %arg7[%c0_18, %c129] : memref<8x512xf32, #tpu.memory_space<vmem>>, vector<8x256xf32>
    %cst_19 = arith.constant 0.000000e+00 : f32
    %38 = vector.broadcast %cst_19 : f32 to vector<8x256xf32>
    %39 = arith.select %24, %37, %38 : vector<8x256xi1>, vector<8x256xf32>
    %c0_20 = arith.constant 0 : index
    %c143 = arith.constant 143 : index
    %40 = vector.load %arg7[%c0_20, %c143] : memref<8x512xf32, #tpu.memory_space<vmem>>, vector<8x256xf32>
    %cst_21 = arith.constant 0.000000e+00 : f32
    %41 = vector.broadcast %cst_21 : f32 to vector<8x256xf32>
    %42 = arith.select %22, %40, %41 : vector<8x256xi1>, vector<8x256xf32>
    %c0_22 = arith.constant 0 : index
    %c144 = arith.constant 144 : index
    %43 = vector.load %arg7[%c0_22, %c144] : memref<8x512xf32, #tpu.memory_space<vmem>>, vector<8x256xf32>
    %c0_23 = arith.constant 0 : index
    %c145 = arith.constant 145 : index
    %44 = vector.load %arg7[%c0_23, %c145] : memref<8x512xf32, #tpu.memory_space<vmem>>, vector<8x256xf32>
    %cst_24 = arith.constant 0.000000e+00 : f32
    %45 = vector.broadcast %cst_24 : f32 to vector<8x256xf32>
    %46 = arith.select %24, %44, %45 : vector<8x256xi1>, vector<8x256xf32>
    %47 = tpu.concatenate %28, %29, %32, %35, %36, %39, %42, %43, %46 in 0 : vector<8x256xf32>, vector<8x256xf32>, vector<8x256xf32>, vector<8x256xf32>, vector<8x256xf32>, vector<8x256xf32>, vector<8x256xf32>, vector<8x256xf32>, vector<8x256xf32> -> vector<72x256xf32>
    %c0_25 = arith.constant 0 : index
    %c0_26 = arith.constant 0 : index
    %c0_27 = arith.constant 0 : index
    %48 = vector.load %arg2[%c0_25, %c0_26, %c0_27] : memref<2x8x72xf32, #tpu.memory_space<vmem>>, vector<1x8x72xf32>
    %49 = vector.shape_cast %48 : vector<1x8x72xf32> to vector<8x72xf32>
    %cst_28 = arith.constant dense<0.000000e+00> : vector<8x256xf32>
    %50 = tpu.matmul %49, %47, %cst_28 {dimension_numbers = #tpu.dot_dimension_numbers<[1], [0], [0], [1], [0, 0, 1, 1], [], []>} : vector<8x72xf32>, vector<72x256xf32>, vector<8x256xf32> -> vector<8x256xf32>
    %c0_29 = arith.constant 0 : index
    %c0_30 = arith.constant 0 : index
    %c0_31 = arith.constant 0 : index
    %51 = vector.load %arg3[%c0_29, %c0_30, %c0_31] : memref<2x8x1xf32, #tpu.memory_space<vmem>>, vector<1x8x1xf32>
    %52 = vector.shape_cast %51 : vector<1x8x1xf32> to vector<8x1xf32>
    %53 = vector.broadcast %52 : vector<8x1xf32> to vector<8x256xf32>
    %54 = arith.addf %50, %53 : vector<8x256xf32>
    %cst_32 = arith.constant 0.000000e+00 : f32
    %55 = vector.broadcast %cst_32 : f32 to vector<8x256xf32>
    %56 = arith.maximumf %54, %55 : vector<8x256xf32>
    %c0_33 = arith.constant 0 : index
    %c128_34 = arith.constant 128 : index
    %57 = vector.load %arg7[%c0_33, %c128_34] : memref<8x512xf32, #tpu.memory_space<vmem>>, vector<8x256xf32>
    tpu.vector_store %arg7[%c0_33, %c128_34], %56 {strides = array<i32>} : memref<8x512xf32, #tpu.memory_space<vmem>>, vector<8x256xf32>,
    %c0_35 = arith.constant 0 : index
    %c111_36 = arith.constant 111 : index
    %58 = vector.load %arg7[%c0_35, %c111_36] : memref<8x512xf32, #tpu.memory_space<vmem>>, vector<8x256xf32>
    %cst_37 = arith.constant 0.000000e+00 : f32
    %59 = vector.broadcast %cst_37 : f32 to vector<8x256xf32>
    %60 = arith.select %22, %58, %59 : vector<8x256xi1>, vector<8x256xf32>
    %c0_38 = arith.constant 0 : index
    %c112_39 = arith.constant 112 : index
    %61 = vector.load %arg7[%c0_38, %c112_39] : memref<8x512xf32, #tpu.memory_space<vmem>>, vector<8x256xf32>
    %c0_40 = arith.constant 0 : index
    %c113_41 = arith.constant 113 : index
    %62 = vector.load %arg7[%c0_40, %c113_41] : memref<8x512xf32, #tpu.memory_space<vmem>>, vector<8x256xf32>
    %cst_42 = arith.constant 0.000000e+00 : f32
    %63 = vector.broadcast %cst_42 : f32 to vector<8x256xf32>
    %64 = arith.select %24, %62, %63 : vector<8x256xi1>, vector<8x256xf32>
    %c0_43 = arith.constant 0 : index
    %c127_44 = arith.constant 127 : index
    %65 = vector.load %arg7[%c0_43, %c127_44] : memref<8x512xf32, #tpu.memory_space<vmem>>, vector<8x256xf32>
    %cst_45 = arith.constant 0.000000e+00 : f32
    %66 = vector.broadcast %cst_45 : f32 to vector<8x256xf32>
    %67 = arith.select %22, %65, %66 : vector<8x256xi1>, vector<8x256xf32>
    %c0_46 = arith.constant 0 : index
    %c128_47 = arith.constant 128 : index
    %68 = vector.load %arg7[%c0_46, %c128_47] : memref<8x512xf32, #tpu.memory_space<vmem>>, vector<8x256xf32>
    %c0_48 = arith.constant 0 : index
    %c129_49 = arith.constant 129 : index
    %69 = vector.load %arg7[%c0_48, %c129_49] : memref<8x512xf32, #tpu.memory_space<vmem>>, vector<8x256xf32>
    %cst_50 = arith.constant 0.000000e+00 : f32
    %70 = vector.broadcast %cst_50 : f32 to vector<8x256xf32>
    %71 = arith.select %24, %69, %70 : vector<8x256xi1>, vector<8x256xf32>
    %c0_51 = arith.constant 0 : index
    %c143_52 = arith.constant 143 : index
    %72 = vector.load %arg7[%c0_51, %c143_52] : memref<8x512xf32, #tpu.memory_space<vmem>>, vector<8x256xf32>
    %cst_53 = arith.constant 0.000000e+00 : f32
    %73 = vector.broadcast %cst_53 : f32 to vector<8x256xf32>
    %74 = arith.select %22, %72, %73 : vector<8x256xi1>, vector<8x256xf32>
    %c0_54 = arith.constant 0 : index
    %c144_55 = arith.constant 144 : index
    %75 = vector.load %arg7[%c0_54, %c144_55] : memref<8x512xf32, #tpu.memory_space<vmem>>, vector<8x256xf32>
    %c0_56 = arith.constant 0 : index
    %c145_57 = arith.constant 145 : index
    %76 = vector.load %arg7[%c0_56, %c145_57] : memref<8x512xf32, #tpu.memory_space<vmem>>, vector<8x256xf32>
    %cst_58 = arith.constant 0.000000e+00 : f32
    %77 = vector.broadcast %cst_58 : f32 to vector<8x256xf32>
    %78 = arith.select %24, %76, %77 : vector<8x256xi1>, vector<8x256xf32>
    %79 = tpu.concatenate %60, %61, %64, %67, %68, %71, %74, %75, %78 in 0 : vector<8x256xf32>, vector<8x256xf32>, vector<8x256xf32>, vector<8x256xf32>, vector<8x256xf32>, vector<8x256xf32>, vector<8x256xf32>, vector<8x256xf32>, vector<8x256xf32> -> vector<72x256xf32>
    %c0_59 = arith.constant 0 : index
    %c0_60 = arith.constant 0 : index
    %c0_61 = arith.constant 0 : index
    %80 = vector.load %arg4[%c0_59, %c0_60, %c0_61] : memref<2x8x72xf32, #tpu.memory_space<vmem>>, vector<1x8x72xf32>
    %81 = vector.shape_cast %80 : vector<1x8x72xf32> to vector<8x72xf32>
    %cst_62 = arith.constant dense<0.000000e+00> : vector<8x256xf32>
    %82 = tpu.matmul %81, %79, %cst_62 {dimension_numbers = #tpu.dot_dimension_numbers<[1], [0], [0], [1], [0, 0, 1, 1], [], []>} : vector<8x72xf32>, vector<72x256xf32>, vector<8x256xf32> -> vector<8x256xf32>
    %c0_63 = arith.constant 0 : index
    %c0_64 = arith.constant 0 : index
    %c0_65 = arith.constant 0 : index
    %83 = vector.load %arg5[%c0_63, %c0_64, %c0_65] : memref<2x8x1xf32, #tpu.memory_space<vmem>>, vector<1x8x1xf32>
    %84 = vector.shape_cast %83 : vector<1x8x1xf32> to vector<8x1xf32>
    %85 = vector.broadcast %84 : vector<8x1xf32> to vector<8x256xf32>
    %86 = arith.addf %82, %85 : vector<8x256xf32>
    %87 = arith.addf %1, %86 : vector<8x256xf32>
    %c0_66 = arith.constant 0 : index
    %c128_67 = arith.constant 128 : index
    %88 = vector.load %arg7[%c0_66, %c128_67] : memref<8x512xf32, #tpu.memory_space<vmem>>, vector<8x256xf32>
    tpu.vector_store %arg7[%c0_66, %c128_67], %87 {strides = array<i32>} : memref<8x512xf32, #tpu.memory_space<vmem>>, vector<8x256xf32>,
    %c0_68 = arith.constant 0 : index
    %c111_69 = arith.constant 111 : index
    %89 = vector.load %arg7[%c0_68, %c111_69] : memref<8x512xf32, #tpu.memory_space<vmem>>, vector<8x256xf32>
    %cst_70 = arith.constant 0.000000e+00 : f32
    %90 = vector.broadcast %cst_70 : f32 to vector<8x256xf32>
    %91 = arith.select %22, %89, %90 : vector<8x256xi1>, vector<8x256xf32>
    %c0_71 = arith.constant 0 : index
    %c112_72 = arith.constant 112 : index
    %92 = vector.load %arg7[%c0_71, %c112_72] : memref<8x512xf32, #tpu.memory_space<vmem>>, vector<8x256xf32>
    %c0_73 = arith.constant 0 : index
    %c113_74 = arith.constant 113 : index
    %93 = vector.load %arg7[%c0_73, %c113_74] : memref<8x512xf32, #tpu.memory_space<vmem>>, vector<8x256xf32>
    %cst_75 = arith.constant 0.000000e+00 : f32
    %94 = vector.broadcast %cst_75 : f32 to vector<8x256xf32>
    %95 = arith.select %24, %93, %94 : vector<8x256xi1>, vector<8x256xf32>
    %c0_76 = arith.constant 0 : index
    %c127_77 = arith.constant 127 : index
    %96 = vector.load %arg7[%c0_76, %c127_77] : memref<8x512xf32, #tpu.memory_space<vmem>>, vector<8x256xf32>
    %cst_78 = arith.constant 0.000000e+00 : f32
    %97 = vector.broadcast %cst_78 : f32 to vector<8x256xf32>
    %98 = arith.select %22, %96, %97 : vector<8x256xi1>, vector<8x256xf32>
    %c0_79 = arith.constant 0 : index
    %c128_80 = arith.constant 128 : index
    %99 = vector.load %arg7[%c0_79, %c128_80] : memref<8x512xf32, #tpu.memory_space<vmem>>, vector<8x256xf32>
    %c0_81 = arith.constant 0 : index
    %c129_82 = arith.constant 129 : index
    %100 = vector.load %arg7[%c0_81, %c129_82] : memref<8x512xf32, #tpu.memory_space<vmem>>, vector<8x256xf32>
    %cst_83 = arith.constant 0.000000e+00 : f32
    %101 = vector.broadcast %cst_83 : f32 to vector<8x256xf32>
    %102 = arith.select %24, %100, %101 : vector<8x256xi1>, vector<8x256xf32>
    %c0_84 = arith.constant 0 : index
    %c143_85 = arith.constant 143 : index
    %103 = vector.load %arg7[%c0_84, %c143_85] : memref<8x512xf32, #tpu.memory_space<vmem>>, vector<8x256xf32>
    %cst_86 = arith.constant 0.000000e+00 : f32
    %104 = vector.broadcast %cst_86 : f32 to vector<8x256xf32>
    %105 = arith.select %22, %103, %104 : vector<8x256xi1>, vector<8x256xf32>
    %c0_87 = arith.constant 0 : index
    %c144_88 = arith.constant 144 : index
    %106 = vector.load %arg7[%c0_87, %c144_88] : memref<8x512xf32, #tpu.memory_space<vmem>>, vector<8x256xf32>
    %c0_89 = arith.constant 0 : index
    %c145_90 = arith.constant 145 : index
    %107 = vector.load %arg7[%c0_89, %c145_90] : memref<8x512xf32, #tpu.memory_space<vmem>>, vector<8x256xf32>
    %cst_91 = arith.constant 0.000000e+00 : f32
    %108 = vector.broadcast %cst_91 : f32 to vector<8x256xf32>
    %109 = arith.select %24, %107, %108 : vector<8x256xi1>, vector<8x256xf32>
    %110 = tpu.concatenate %91, %92, %95, %98, %99, %102, %105, %106, %109 in 0 : vector<8x256xf32>, vector<8x256xf32>, vector<8x256xf32>, vector<8x256xf32>, vector<8x256xf32>, vector<8x256xf32>, vector<8x256xf32>, vector<8x256xf32>, vector<8x256xf32> -> vector<72x256xf32>
    %c1 = arith.constant 1 : index
    %c0_92 = arith.constant 0 : index
    %c0_93 = arith.constant 0 : index
    %111 = vector.load %arg2[%c1, %c0_92, %c0_93] : memref<2x8x72xf32, #tpu.memory_space<vmem>>, vector<1x8x72xf32>
    %112 = vector.shape_cast %111 : vector<1x8x72xf32> to vector<8x72xf32>
    %cst_94 = arith.constant dense<0.000000e+00> : vector<8x256xf32>
    %113 = tpu.matmul %112, %110, %cst_94 {dimension_numbers = #tpu.dot_dimension_numbers<[1], [0], [0], [1], [0, 0, 1, 1], [], []>} : vector<8x72xf32>, vector<72x256xf32>, vector<8x256xf32> -> vector<8x256xf32>
    %c1_95 = arith.constant 1 : index
    %c0_96 = arith.constant 0 : index
    %c0_97 = arith.constant 0 : index
    %114 = vector.load %arg3[%c1_95, %c0_96, %c0_97] : memref<2x8x1xf32, #tpu.memory_space<vmem>>, vector<1x8x1xf32>
    %115 = vector.shape_cast %114 : vector<1x8x1xf32> to vector<8x1xf32>
    %116 = vector.broadcast %115 : vector<8x1xf32> to vector<8x256xf32>
    %117 = arith.addf %113, %116 : vector<8x256xf32>
    %cst_98 = arith.constant 0.000000e+00 : f32
    %118 = vector.broadcast %cst_98 : f32 to vector<8x256xf32>
    %119 = arith.maximumf %117, %118 : vector<8x256xf32>
    %c0_99 = arith.constant 0 : index
    %c128_100 = arith.constant 128 : index
    %120 = vector.load %arg7[%c0_99, %c128_100] : memref<8x512xf32, #tpu.memory_space<vmem>>, vector<8x256xf32>
    tpu.vector_store %arg7[%c0_99, %c128_100], %119 {strides = array<i32>} : memref<8x512xf32, #tpu.memory_space<vmem>>, vector<8x256xf32>,
    %c0_101 = arith.constant 0 : index
    %c111_102 = arith.constant 111 : index
    %121 = vector.load %arg7[%c0_101, %c111_102] : memref<8x512xf32, #tpu.memory_space<vmem>>, vector<8x256xf32>
    %cst_103 = arith.constant 0.000000e+00 : f32
    %122 = vector.broadcast %cst_103 : f32 to vector<8x256xf32>
    %123 = arith.select %22, %121, %122 : vector<8x256xi1>, vector<8x256xf32>
    %c0_104 = arith.constant 0 : index
    %c112_105 = arith.constant 112 : index
    %124 = vector.load %arg7[%c0_104, %c112_105] : memref<8x512xf32, #tpu.memory_space<vmem>>, vector<8x256xf32>
    %c0_106 = arith.constant 0 : index
    %c113_107 = arith.constant 113 : index
    %125 = vector.load %arg7[%c0_106, %c113_107] : memref<8x512xf32, #tpu.memory_space<vmem>>, vector<8x256xf32>
    %cst_108 = arith.constant 0.000000e+00 : f32
    %126 = vector.broadcast %cst_108 : f32 to vector<8x256xf32>
    %127 = arith.select %24, %125, %126 : vector<8x256xi1>, vector<8x256xf32>
    %c0_109 = arith.constant 0 : index
    %c127_110 = arith.constant 127 : index
    %128 = vector.load %arg7[%c0_109, %c127_110] : memref<8x512xf32, #tpu.memory_space<vmem>>, vector<8x256xf32>
    %cst_111 = arith.constant 0.000000e+00 : f32
    %129 = vector.broadcast %cst_111 : f32 to vector<8x256xf32>
    %130 = arith.select %22, %128, %129 : vector<8x256xi1>, vector<8x256xf32>
    %c0_112 = arith.constant 0 : index
    %c128_113 = arith.constant 128 : index
    %131 = vector.load %arg7[%c0_112, %c128_113] : memref<8x512xf32, #tpu.memory_space<vmem>>, vector<8x256xf32>
    %c0_114 = arith.constant 0 : index
    %c129_115 = arith.constant 129 : index
    %132 = vector.load %arg7[%c0_114, %c129_115] : memref<8x512xf32, #tpu.memory_space<vmem>>, vector<8x256xf32>
    %cst_116 = arith.constant 0.000000e+00 : f32
    %133 = vector.broadcast %cst_116 : f32 to vector<8x256xf32>
    %134 = arith.select %24, %132, %133 : vector<8x256xi1>, vector<8x256xf32>
    %c0_117 = arith.constant 0 : index
    %c143_118 = arith.constant 143 : index
    %135 = vector.load %arg7[%c0_117, %c143_118] : memref<8x512xf32, #tpu.memory_space<vmem>>, vector<8x256xf32>
    %cst_119 = arith.constant 0.000000e+00 : f32
    %136 = vector.broadcast %cst_119 : f32 to vector<8x256xf32>
    %137 = arith.select %22, %135, %136 : vector<8x256xi1>, vector<8x256xf32>
    %c0_120 = arith.constant 0 : index
    %c144_121 = arith.constant 144 : index
    %138 = vector.load %arg7[%c0_120, %c144_121] : memref<8x512xf32, #tpu.memory_space<vmem>>, vector<8x256xf32>
    %c0_122 = arith.constant 0 : index
    %c145_123 = arith.constant 145 : index
    %139 = vector.load %arg7[%c0_122, %c145_123] : memref<8x512xf32, #tpu.memory_space<vmem>>, vector<8x256xf32>
    %cst_124 = arith.constant 0.000000e+00 : f32
    %140 = vector.broadcast %cst_124 : f32 to vector<8x256xf32>
    %141 = arith.select %24, %139, %140 : vector<8x256xi1>, vector<8x256xf32>
    %142 = tpu.concatenate %123, %124, %127, %130, %131, %134, %137, %138, %141 in 0 : vector<8x256xf32>, vector<8x256xf32>, vector<8x256xf32>, vector<8x256xf32>, vector<8x256xf32>, vector<8x256xf32>, vector<8x256xf32>, vector<8x256xf32>, vector<8x256xf32> -> vector<72x256xf32>
    %c1_125 = arith.constant 1 : index
    %c0_126 = arith.constant 0 : index
    %c0_127 = arith.constant 0 : index
    %143 = vector.load %arg4[%c1_125, %c0_126, %c0_127] : memref<2x8x72xf32, #tpu.memory_space<vmem>>, vector<1x8x72xf32>
    %144 = vector.shape_cast %143 : vector<1x8x72xf32> to vector<8x72xf32>
    %cst_128 = arith.constant dense<0.000000e+00> : vector<8x256xf32>
    %145 = tpu.matmul %144, %142, %cst_128 {dimension_numbers = #tpu.dot_dimension_numbers<[1], [0], [0], [1], [0, 0, 1, 1], [], []>} : vector<8x72xf32>, vector<72x256xf32>, vector<8x256xf32> -> vector<8x256xf32>
    %c1_129 = arith.constant 1 : index
    %c0_130 = arith.constant 0 : index
    %c0_131 = arith.constant 0 : index
    %146 = vector.load %arg5[%c1_129, %c0_130, %c0_131] : memref<2x8x1xf32, #tpu.memory_space<vmem>>, vector<1x8x1xf32>
    %147 = vector.shape_cast %146 : vector<1x8x1xf32> to vector<8x1xf32>
    %148 = vector.broadcast %147 : vector<8x1xf32> to vector<8x256xf32>
    %149 = arith.addf %145, %148 : vector<8x256xf32>
    %150 = arith.addf %87, %149 : vector<8x256xf32>
    %c0_132 = arith.constant 0 : index
    %c0_133 = arith.constant 0 : index
    %c0_134 = arith.constant 0 : index
    %151 = vector.load %arg6[%c0_132, %c0_133, %c0_134] : memref<1x8x256xf32, #tpu.memory_space<vmem>>, vector<1x8x256xf32>
    %152 = vector.shape_cast %151 : vector<1x8x256xf32> to vector<8x256xf32>
    %153 = vector.shape_cast %150 : vector<8x256xf32> to vector<1x8x256xf32>
    tpu.vector_store %arg6[%c0_132, %c0_133, %c0_134], %153 {strides = array<i32>} : memref<1x8x256xf32, #tpu.memory_space<vmem>>, vector<1x8x256xf32>,
    return
  }
  func.func @transform_0(%arg0: i32) -> (i32, i32, i32) {
    %c0_i32 = arith.constant 0 : i32
    %c0_i32_0 = arith.constant 0 : i32
    %c0_i32_1 = arith.constant 0 : i32
    return %arg0, %c0_i32, %c0_i32_0 : i32, i32, i32
  }
  func.func @transform_1(%arg0: i32) -> (i32, i32, i32) {
    %c0_i32 = arith.constant 0 : i32
    %c0_i32_0 = arith.constant 0 : i32
    %c0_i32_1 = arith.constant 0 : i32
    %c0_i32_2 = arith.constant 0 : i32
    return %c0_i32, %c0_i32_0, %c0_i32_1 : i32, i32, i32
  }
  func.func @transform_2(%arg0: i32) -> (i32, i32, i32) {
    %c0_i32 = arith.constant 0 : i32
    %c0_i32_0 = arith.constant 0 : i32
    %c0_i32_1 = arith.constant 0 : i32
    %c0_i32_2 = arith.constant 0 : i32
    return %c0_i32, %c0_i32_0, %c0_i32_1 : i32, i32, i32
  }
  func.func @transform_3(%arg0: i32) -> (i32, i32, i32) {
    %c0_i32 = arith.constant 0 : i32
    %c0_i32_0 = arith.constant 0 : i32
    %c0_i32_1 = arith.constant 0 : i32
    %c0_i32_2 = arith.constant 0 : i32
    return %c0_i32, %c0_i32_0, %c0_i32_1 : i32, i32, i32
  }
  func.func @transform_4(%arg0: i32) -> (i32, i32, i32) {
    %c0_i32 = arith.constant 0 : i32
    %c0_i32_0 = arith.constant 0 : i32
    %c0_i32_1 = arith.constant 0 : i32
    %c0_i32_2 = arith.constant 0 : i32
    return %c0_i32, %c0_i32_0, %c0_i32_1 : i32, i32, i32
  }
  func.func @transform_5(%arg0: i32) -> (i32, i32, i32) {
    %c0_i32 = arith.constant 0 : i32
    %c0_i32_0 = arith.constant 0 : i32
    %c0_i32_1 = arith.constant 0 : i32
    return %arg0, %c0_i32, %c0_i32_0 : i32, i32, i32
  }
}

</mosaic_0001>

<bundles_post_ra>
// kernel: tpu_custom_call.1
= control target key start
LH: loop header
LB: loop body
LE: loop exit
PB: predicated region body
PF: predicated region fallthrough
CT: control target
= control target key end

     0   :  { %10 = vsyncpa [#allocation4], 0  ;;  %s1880_s0 = inlined_call_operand.vmem [shape: f32[2,8,256], index: 0, kind: input, shape index: {}]   ;;  %s1881_s1 = inlined_call_operand.hbm [shape: f32[2,8,72], index: 1, kind: input, shape index: {}]   ;;  %s1882_s2 = inlined_call_operand.vmem [shape: f32[2,8,1], index: 2, kind: input, shape index: {}]   ;;  %s1883_s3 = inlined_call_operand.hbm [shape: f32[2,8,72], index: 3, kind: input, shape index: {}]   ;;  %s1884_s4 = inlined_call_operand.vmem [shape: f32[2,8,1], index: 4, kind: input, shape index: {}]   ;;  %s1885_s5 = inlined_call_operand.hbm [shape: f32[2,8,256], index: 5, kind: output, shape index: {}]  }
   0x1   :  { %11 = vsyncpa [#allocation7], 0 }
   0x2   :  { %12 = vsyncpa [#allocation5], 0 }
   0x3   :  { %14 = vsyncpa [#allocation5 + $0x1], 0  ;;  %s1406_s18 = smov 0   ;;  %s1408_s19 = smov 0  }
   0x4   :  { %s1410_s20 = smov 0   ;;  %s1412_s21 = smov 0  }
   0x5 LB: > { %s1427_s22 = sadd.s32 4294967295, %s1360_s21   ;;  %s1039_s23 = sadd.s32 4294967294, %s1360_s21   ;;  %s1360_s21 = sphi %s1412_s21, %s1900_s21   ;;  %s1356_s20 = sphi %s1410_s20, %s1899_s20   ;;  %s1352_s19 = sphi %s1408_s19, %s1898_s19   ;;  %s1348_s18 = sphi %s1406_s18, %s1897_s18  }
   0x6   : > { %s1431_s24 = sadd.s32 1, %s1360_s21   ;;  %s137_s25 = sadd.s32 1, %s1356_s20 }
   0x7   : > { %s134_s26 = ssub.s32 %s1360_s21, %s1431_s24  ;;  %p147_p0 = scmp.ne.s32.totalorder %s1356_s20, %s1352_s19 }
   0x8   : > { %p135_p1 = scmp.eq.s32.totalorder %s134_s26, 0  ;;  %p148_p2 = scmp.eq.s32.totalorder %s1427_s22, 1 }
   0x9   : > { %p153_p3 = scmp.ne.s32.totalorder %s1352_s19, %s1348_s18  ;;  %p154_p4 = scmp.eq.s32.totalorder %s1039_s23, 1 }
   0xa   : > { %s1442_s27 = scalar_select %p135_p1, %s1356_s20, %s137_s25  }
   0xb   : > { %p1444_p5 = por %p148_p2, %p147_p0  ;;  %p1448_p6 = por %p154_p4, %p153_p3 }
   0xc   : > { %p1040_p7 = scmp.ge.s32.totalorder %s1360_s21, 1  ;;  %p161_p8 = scmp.lt.s32.totalorder %s1360_s21, 3 }
   0xd   : > { %p1136_p9 = scmp.eq.s32.totalorder %s1427_s22, 0  ;;  %s172_s8 = sshll.u32 %s1881_s1, 4  ;;  %s173_s8 = int_to_ptr.hbm [resolvable:$true] %s172_s8 }
   0xe   : > { %p1455_p10 = pnand %p1040_p7, %p161_p8  ;;  %s1362_s9 = smov [#allocation3]  }
   0xf   : > { %s174_s10 = sshll.u32 %s1362_s9, 4  ;;  %s189_s13 = sshll.u32 %s1883_s3, 4  ;;  %s175_s10 = int_to_ptr.vmem [resolvable:$true] %s174_s10  ;;  %s190_s13 = int_to_ptr.hbm [resolvable:$true] %s189_s13 }
  0x10   : > { %p1125_p11 = pneg %p1455_p10  ;;  %s1363_s14 = smov 128  }
  0x11   : > { %s1364_s15 = smov 8   ;;  %s1365_s16 = smov [#allocation6]  }
  0x12   : > { %p1126_p12 = pnand %p1136_p9, %p1125_p11  ;;  %s191_s17 = sshll.u32 %s1365_s16, 4  ;;  %s192_s17 = int_to_ptr.vmem [resolvable:$true] %s191_s17 }
  0x13   : > { %218 = sbr.rel (%p1455_p10) target bundleno = 1205 (0x4b5), region = 40 }
  0x14   : > { %1128 = dma.hbm_to_vmem [thread:$0]  (!%p1126_p12), %s173_s8, 256, %s175_s10, [#allocation4], %s1363_s14, %s1363_s14, %s1364_s15  }
  0x15   : > { %1131 = dma.hbm_to_vmem [thread:$0]  (!%p1126_p12), %s190_s13, 256, %s192_s17, [#allocation7], %s1363_s14, %s1363_s14, %s1364_s15  }
  0x18   : > { %1335 = dma.done.wait (%p1136_p9), [#allocation4], 256  }
  0x19   : > { %1337 = vsyncadd (%p1136_p9), [#allocation4], 4294967040 }
  0x1a   : > { %1339 = dma.done.wait (%p1136_p9), [#allocation7], 256  }
  0x1b   : > { %1341 = vsyncadd (%p1136_p9), [#allocation7], 4294967040  ;;  %p252_p13 = scmp.lt.s32.totalorder %s1427_s22, 1  ;;  %v1366_v0 = vmov 0.0   ;;  %s1367_s23 = smov 111   ;;  %v263_v7 = vlaneseq  ;;  %vm379_vm0 = vcmask 908288  }
  0x1c   : > { %377 = vrot.lane.b32.xlu1 %v1366_v0, %s1367_s23  ;;  %s1368_s26 = smov 112   ;;  %s1369_s9 = smov 113   ;;  %vm403_vm3 = vcmask 916480   ;;  %vm366_vm4 = vcmask 924672   ;;  %vm353_vm7 = vcmask 1039360   ;;  %v409_v35 = vld [vmem:[%s1882_s2] sm:$0xff] }
  0x1d   : > { %s253_s25 = scalar_select %p252_p13, %s1427_s22, 1  ;;  %401 = vrot.lane.b32.xlu2 %v1366_v0, %s1368_s26  ;;  %v264_v9 = vand.u32 127, %v263_v7  ;;  %v1375_v38 = vmov 0   ;;  %vm334_vm8 = vcmask 7168   ;;  %vm321_vm9 = vcmask 121856   ;;  %v408_v54 = vld [vmem:[#allocation3] sm:$0xff] }
  0x1e   : > { %s1370_s10 = smov 127   ;;  %s1371_s11 = smov 1   ;;  %1197 = vset.pattern.permute.xlu1 %v1375_v38  ;;  %1208 = vset.pattern.permute.xlu0 %v1375_v38  ;;  %vm392_vm10 = vcmask 130048   ;;  %vm308_vm11 = vcmask 138240   ;;  %vm415_vm12 = vcmask 588800  }
  0x1f   : > { %s1113_s30 = sshll.u32 %s253_s25, 4  ;;  %s1372_s12 = smov 15   ;;  %v265_v10 = vadd.s32 128, %v264_v9  ;;  %v270_v14 = vand.u32 15, %v264_v9  ;;  %1229 = vset.pattern.permute.xlu2 %v1375_v38 }
  0x20   : > { %s256_s8 = scalar_lea.vmem %s1880_s0, %s1113_s30  ;;  %s1373_s13 = smov 16  }
  0x21   : > { %v1488_v1 = vld [vmem:[%s256_s8] sm:$0xff]  ;;  %v1490_v2 = vld [vmem:[%s256_s8 + $0x8] sm:$0xff]  ;;  %s1374_s14 = smov 17   ;;  %v277_v15 = vand.u32 15, %v265_v10  ;;  %vm1540_vm1 = vcmp.ne.s32.totalorder %v270_v14, 15  ;;  %vm1556_vm5 = vcmp.ne.s32.totalorder %v270_v14, 0 }
  0x22   : > { %373 = vrot.lane.b32.xlu0 %v1488_v1, %s1367_s23  ;;  %v1187_v3 = vpack.i.bf16 %v1490_v2, %v1488_v1  ;;  %v1192_v4 = vpack.i.bf16 %v1488_v1, %v1366_v0  ;;  %s249_s7 = sand.u32 1, %s1352_s19   ;;  %s1310_s6 = scalar_lea.hbm %s1885_s5, 32 }
  0x23   : > { %vm1544_vm2 = vcmp.ne.s32.totalorder %v277_v15, 15  ;;  %vm1560_vm6 = vcmp.ne.s32.totalorder %v277_v15, 0  ;;  %s1047_s8 = sshll.u32 %s249_s7, 4  ;;  %s942_s16 = scalar_lea.sflag [#allocation5], %s249_s7 }
  0x24   : > { %1188 = vrot.lane.b32.xlu1 %v1187_v3, %s1368_s26 }
  0x25   : > { %360 = vrot.lane.b32.xlu2 %v1488_v1, %s1369_s9 }
  0x2a   : > { %375 = vrot.lane.b32.xlu0 %v1490_v2, %s1367_s23 }
  0x2c   : > { %364 = vrot.lane.b32.xlu1 %v1366_v0, %s1369_s9 }
  0x2d   : > { %347 = vrot.lane.b32.xlu2 %v1488_v1, %s1370_s10 }
  0x32   : > { %362 = vrot.lane.b32.xlu0 %v1490_v2, %s1369_s9 }
  0x34   : > { %351 = vrot.lane.b32.xlu1 %v1366_v0, %s1370_s10 }
  0x35   : > { %328 = vrot.lane.b32.xlu2 %v1366_v0, %s1371_s11 }
  0x3a   : > { %349 = vrot.lane.b32.xlu0 %v1490_v2, %s1370_s10 }
  0x3c   : > { %332 = vrot.lane.b32.xlu1 %v1490_v2, %s1371_s11 }
  0x3d   : > { %315 = vrot.lane.b32.xlu2 %v1366_v0, %s1372_s12 }
  0x42   : > { %330 = vrot.lane.b32.xlu0 %v1488_v1, %s1371_s11 }
  0x44   : > { %319 = vrot.lane.b32.xlu1 %v1490_v2, %s1372_s12 }
  0x45   : > { %1193 = vrot.lane.b32.xlu2 %v1192_v4, %s1373_s13 }
  0x4a   : > { %317 = vrot.lane.b32.xlu0 %v1488_v1, %s1372_s12 }
  0x4c   : > { %302 = vrot.lane.b32.xlu1 %v1366_v0, %s1374_s14 }
  0x4d   : > { %304 = vrot.lane.b32.xlu2 %v1488_v1, %s1374_s14 }
  0x52   : > { %390 = vrot.lane.b32.xlu0 %v1490_v2, %s1373_s13 }
  0x54   : > { %412 = vperm.xlu1 %1197, %v409_v35  }
  0x5a   : > { %306 = vrot.lane.b32.xlu0 %v1490_v2, %s1374_s14 }
  0x5c   : > { %539 = vrot.lane.b32.xlu1 %v1366_v0, %s1367_s23 }
  0x62   : > { %561 = vrot.lane.b32.xlu0 %v1366_v0, %s1368_s26 }
  0x64   : > { %493 = vrot.lane.b32.xlu1 %v1366_v0, %s1371_s11 }
  0x6a   : > { %527 = vrot.lane.b32.xlu0 %v1366_v0, %s1369_s9 }
  0x6c   : > { %481 = vrot.lane.b32.xlu1 %v1366_v0, %s1372_s12 }
  0x72   : > { %515 = vrot.lane.b32.xlu0 %v1366_v0, %s1370_s10 }
  0x77   : > { %v402_v5 = vpop.permute.xlu2 %401 }
  0x7f   : > { %v361_v6 = vpop.permute.xlu2 %360 }
  0x87   : > { %v348_v12 = vpop.permute.xlu2 %347 }
  0x8e   : > { %v378_v8 = vpop.permute.xlu1 %377 }
  0x8f   : > { %v329_v25 = vpop.permute.xlu2 %328 }
  0x94   : > { %v374_v11 = vpop.permute.xlu0 %373 }
  0x96   : > { %v1189_v13 = vpop.permute.xlu1 %1188 }
  0x97   : > { %v1190_v16 = vunpack.i.l.bf16 %v1189_v13  ;;  %v1191_v17 = vunpack.i.h.bf16 %v1189_v13  ;;  %v316_v33 = vpop.permute.xlu2 %315 }
  0x99   : > { %v404_v23 = vsel %vm403_vm3, %v1190_v16, %v1191_v17  ;;  %v405_v26 = vsel %vm403_vm3, %v1191_v17, %v402_v5 }
  0x9c   : > { %v376_v20 = vpop.permute.xlu0 %375 }
  0x9d   : > { %v380_v21 = vsel %vm379_vm0, %v374_v11, %v376_v20  ;;  %v381_v22 = vsel %vm379_vm0, %v376_v20, %v378_v8  ;;  %v568_v20 = vld [vmem:[%s1884_s4] sm:$0xff] }
  0x9e   : > { %1050 = vmatpush.msk.msra.mxu0 %vm1540_vm1, %v380_v21  ;;  %1057 = vmatpush.msk.msra.mxu1 %vm1544_vm2, %v381_v22  ;;  %v365_v24 = vpop.permute.xlu1 %364 }
  0x9f   : > { %v1194_v40 = vpop.permute.xlu2 %1193 }
  0xa0   : > { %447 = vmatpush.msra.mxu1 %v405_v26  ;;  %427 = vmatpush.msra.mxu0 %v404_v23  ;;  %v1196_v45 = vunpack.i.h.bf16 %v1194_v40  ;;  %v1195_v46 = vunpack.i.l.bf16 %v1194_v40 }
  0xa2   : > { %v393_v51 = vsel %vm392_vm10, %v1195_v46, %v1196_v45 }
  0xa4   : > { %v363_v29 = vpop.permute.xlu0 %362 }
  0xa5   : > { %v367_v30 = vsel %vm366_vm4, %v361_v6, %v363_v29  ;;  %v368_v31 = vsel %vm366_vm4, %v363_v29, %v365_v24 }
  0xa6   : > { %1051 = vmatpush.msk.msra.mxu0 %vm1556_vm5, %v367_v30  ;;  %1058 = vmatpush.msk.msra.mxu1 %vm1560_vm6, %v368_v31  ;;  %v352_v32 = vpop.permute.xlu1 %351 }
  0xa7   : > { %v305_v48 = vpop.permute.xlu2 %304 }
  0xac   : > { %v350_v34 = vpop.permute.xlu0 %349 }
  0xad   : > { %v354_v36 = vsel %vm353_vm7, %v348_v12, %v350_v34  ;;  %v355_v37 = vsel %vm353_vm7, %v350_v34, %v352_v32 }
  0xae   : > { %1052 = vmatpush.msk.msra.mxu0 %vm1540_vm1, %v354_v36  ;;  %1059 = vmatpush.msk.msra.mxu1 %vm1544_vm2, %v355_v37  ;;  %v333_v39 = vpop.permute.xlu1 %332 }
  0xb0   : > { %430 = vmatpush.msra.mxu0 %v1488_v1  ;;  %450 = vmatpush.msra.mxu1 %v1490_v2 }
  0xb4   : > { %v331_v41 = vpop.permute.xlu0 %330 }
  0xb5   : > { %v335_v42 = vsel %vm334_vm8, %v329_v25, %v331_v41  ;;  %v336_v43 = vsel %vm334_vm8, %v331_v41, %v333_v39 }
  0xb6   : > { %1053 = vmatpush.msk.msra.mxu0 %vm1556_vm5, %v335_v42  ;;  %1060 = vmatpush.msk.msra.mxu1 %vm1560_vm6, %v336_v43  ;;  %v320_v44 = vpop.permute.xlu1 %319 }
  0xbc   : > { %v318_v47 = vpop.permute.xlu0 %317 }
  0xbd   : > { %v322_v49 = vsel %vm321_vm9, %v316_v33, %v318_v47  ;;  %v323_v50 = vsel %vm321_vm9, %v318_v47, %v320_v44 }
  0xbe   : > { %1054 = vmatpush.msk.msra.mxu0 %vm1540_vm1, %v322_v49  ;;  %1061 = vmatpush.msk.msra.mxu1 %vm1544_vm2, %v323_v50  ;;  %v303_v52 = vpop.permute.xlu1 %302 }
  0xbf   : > { %v309_v53 = vsel %vm308_vm11, %v303_v52, %v305_v48 }
  0xc0   : > { %433 = vmatpush.msra.mxu0 %v393_v51  ;;  %v567_v51 = vld [vmem:[#allocation6] sm:$0xff] }
  0xc2   : > { %1055 = vmatpush.msk.msra.mxu0 %vm1556_vm5, %v309_v53 }
  0xc3   : > { %1056 = vmatmul.msk.f32.vlgmr.msra.gmra.mxu0 %vm415_vm12, %v408_v54 }
  0xc4   : > { %v391_v55 = vpop.permute.xlu0 %390 }
  0xc5   : > { %v394_v56 = vsel %vm392_vm10, %v1196_v45, %v391_v55 }
  0xc6   : > { %453 = vmatpush.msra.mxu1 %v394_v56  ;;  %v413_v59 = vpop.permute.xlu1 %412 }
  0xcc   : > { %v307_v57 = vpop.permute.xlu0 %306 }
  0xcd   : > { %v310_v58 = vsel %vm308_vm11, %v305_v48, %v307_v57 }
  0xce   : > { %1062 = vmatpush.msk.msra.mxu1 %vm1560_vm6, %v310_v58  ;;  %v540_v7 = vpop.permute.xlu1 %539 }
  0xcf   : > { %1063 = vmatmul.msk.f32.vlgmr.msra.gmra.mxu1 %vm415_vm12, %v408_v54 }
  0xd4   : > { %v562_v10 = vpop.permute.xlu0 %561 }
  0xd6   : > { %v494_v9 = vpop.permute.xlu1 %493 }
  0xdc   : > { %v528_v13 = vpop.permute.xlu0 %527 }
  0xde   : > { %v482_v12 = vpop.permute.xlu1 %481 }
  0xe4   : > { %v516_v16 = vpop.permute.xlu0 %515 }
 0x140   : > { %v436_v60 = vpop.f32.mrf.mxu0 }
 0x141   : > { %v437_v61 = vadd.f32 %v436_v60, %v413_v59 }
 0x143   : > { %v459_v62 = vmax.f32 %v437_v61, 0.0 }
 0x145   : > { %523 = vrot.lane.b32.xlu1 %v459_v62, %s1369_s9  ;;  %535 = vrot.lane.b32.xlu2 %v459_v62, %s1367_s23  ;;  %v1203_v6 = vpack.i.bf16 %v459_v62, %v1366_v0 }
 0x14c   : > { %v456_v63 = vpop.f32.mrf.mxu1 }
 0x14d   : > { %v457_v3 = vadd.f32 %v456_v63, %v413_v59  ;;  %511 = vrot.lane.b32.xlu1 %v459_v62, %s1370_s10 }
 0x14f   : > { %v460_v4 = vmax.f32 %v457_v3, 0.0 }
 0x151   : > { %537 = vrot.lane.b32.xlu0 %v460_v4, %s1367_s23  ;;  %v1198_v5 = vpack.i.bf16 %v460_v4, %v459_v62 }
 0x153   : > { %1199 = vrot.lane.b32.xlu2 %v1198_v5, %s1368_s26 }
 0x155   : > { %1204 = vrot.lane.b32.xlu1 %v1203_v6, %s1373_s13 }
 0x159   : > { %497 = vrot.lane.b32.xlu0 %v460_v4, %s1371_s11 }
 0x15b   : > { %525 = vrot.lane.b32.xlu2 %v460_v4, %s1369_s9 }
 0x15d   : > { %471 = vrot.lane.b32.xlu1 %v459_v62, %s1374_s14 }
 0x161   : > { %485 = vrot.lane.b32.xlu0 %v460_v4, %s1372_s12 }
 0x163   : > { %513 = vrot.lane.b32.xlu2 %v460_v4, %s1370_s10 }
 0x165   : > { %697 = vrot.lane.b32.xlu1 %v1366_v0, %s1367_s23 }
 0x169   : > { %469 = vrot.lane.b32.xlu0 %v1366_v0, %s1374_s14 }
 0x16b   : > { %495 = vrot.lane.b32.xlu2 %v459_v62, %s1371_s11 }
 0x16d   : > { %651 = vrot.lane.b32.xlu1 %v1366_v0, %s1371_s11 }
 0x171   : > { %571 = vperm.xlu0 %1208, %v568_v20  }
 0x173   : > { %483 = vrot.lane.b32.xlu2 %v459_v62, %s1372_s12 }
 0x175   : > { %639 = vrot.lane.b32.xlu1 %v1366_v0, %s1372_s12 }
 0x179   : > { %719 = vrot.lane.b32.xlu0 %v1366_v0, %s1368_s26 }
 0x17b   : > { %551 = vrot.lane.b32.xlu2 %v460_v4, %s1373_s13 }
 0x181   : > { %685 = vrot.lane.b32.xlu0 %v1366_v0, %s1369_s9 }
 0x183   : > { %473 = vrot.lane.b32.xlu2 %v460_v4, %s1374_s14 }
 0x189   : > { %673 = vrot.lane.b32.xlu0 %v1366_v0, %s1370_s10 }
 0x19f   : > { %v536_v8 = vpop.permute.xlu2 %535 }
 0x1ad   : > { %v1200_v11 = vpop.permute.xlu2 %1199 }
 0x1ae   : > { %v1202_v22 = vunpack.i.h.bf16 %v1200_v11  ;;  %v1201_v23 = vunpack.i.l.bf16 %v1200_v11 }
 0x1b0   : > { %v563_v30 = vsel %vm403_vm3, %v1201_v23, %v1202_v22  ;;  %v564_v31 = vsel %vm403_vm3, %v1202_v22, %v562_v10 }
 0x1b5   : > { %v526_v14 = vpop.permute.xlu2 %525 }
 0x1b6   : > { %v530_v33 = vsel %vm366_vm4, %v526_v14, %v528_v13 }
 0x1b7   : > { %v524_v15 = vpop.permute.xlu1 %523 }
 0x1b8   : > { %v529_v32 = vsel %vm366_vm4, %v524_v15, %v526_v14 }
 0x1bd   : > { %v514_v17 = vpop.permute.xlu2 %513 }
 0x1be   : > { %v518_v35 = vsel %vm353_vm7, %v514_v17, %v516_v16 }
 0x1bf   : > { %v512_v21 = vpop.permute.xlu1 %511 }
 0x1c0   : > { %v517_v34 = vsel %vm353_vm7, %v512_v21, %v514_v17 }
 0x1c3   : > { %v538_v24 = vpop.permute.xlu0 %537 }
 0x1c4   : > { %v541_v25 = vsel %vm379_vm0, %v536_v8, %v538_v24  ;;  %v542_v26 = vsel %vm379_vm0, %v538_v24, %v540_v7 }
 0x1c5   : > { %v496_v29 = vpop.permute.xlu2 %495  ;;  %1064 = vmatpush.msk.msra.mxu2 %vm1540_vm1, %v541_v25  ;;  %1071 = vmatpush.msk.msra.mxu3 %vm1544_vm2, %v542_v26 }
 0x1c6   : > { %v499_v41 = vsel %vm334_vm8, %v494_v9, %v496_v29 }
 0x1c7   : > { %585 = vmatpush.msra.mxu2 %v563_v30  ;;  %605 = vmatpush.msra.mxu3 %v564_v31  ;;  %v1205_v36 = vpop.permute.xlu1 %1204 }
 0x1c8   : > { %v1207_v39 = vunpack.i.h.bf16 %v1205_v36  ;;  %v1206_v40 = vunpack.i.l.bf16 %v1205_v36 }
 0x1c9   : > { %1065 = vmatpush.msk.msra.mxu2 %vm1556_vm5, %v529_v32  ;;  %1072 = vmatpush.msk.msra.mxu3 %vm1560_vm6, %v530_v33 }
 0x1ca   : > { %v553_v44 = vsel %vm392_vm10, %v1206_v40, %v1207_v39 }
 0x1cb   : > { %1066 = vmatpush.msk.msra.mxu2 %vm1540_vm1, %v517_v34  ;;  %1073 = vmatpush.msk.msra.mxu3 %vm1544_vm2, %v518_v35  ;;  %v498_v37 = vpop.permute.xlu0 %497 }
 0x1cc   : > { %v500_v42 = vsel %vm334_vm8, %v496_v29, %v498_v37 }
 0x1cd   : > { %v484_v38 = vpop.permute.xlu2 %483  ;;  %588 = vmatpush.msra.mxu2 %v459_v62  ;;  %608 = vmatpush.msra.mxu3 %v460_v4  ;;  %v1078_v62 = vld [vmem:[%s1882_s2 + $0x8] sm:$0xff] }
 0x1ce   : > { %v487_v43 = vsel %vm321_vm9, %v482_v12, %v484_v38 }
 0x1cf   : > { %1067 = vmatpush.msk.msra.mxu2 %vm1556_vm5, %v499_v41  ;;  %1074 = vmatpush.msk.msra.mxu3 %vm1560_vm6, %v500_v42  ;;  %v472_v49 = vpop.permute.xlu1 %471 }
 0x1d1   : > { %1068 = vmatpush.msk.msra.mxu2 %vm1540_vm1, %v487_v43 }
 0x1d3   : > { %591 = vmatpush.msra.mxu2 %v553_v44  ;;  %v486_v45 = vpop.permute.xlu0 %485 }
 0x1d4   : > { %v488_v46 = vsel %vm321_vm9, %v484_v38, %v486_v45  ;;  %v726_v45 = vld [vmem:[#allocation3 + $0x8] sm:$0xff] }
 0x1d5   : > { %v552_v47 = vpop.permute.xlu2 %551  ;;  %1075 = vmatpush.msk.msra.mxu3 %vm1544_vm2, %v488_v46 }
 0x1d6   : > { %v554_v48 = vsel %vm392_vm10, %v1207_v39, %v552_v47 }
 0x1d7   : > { %611 = vmatpush.msra.mxu3 %v554_v48  ;;  %v698_v63 = vpop.permute.xlu1 %697 }
 0x1db   : > { %v470_v50 = vpop.permute.xlu0 %469 }
 0x1dc   : > { %v475_v52 = vsel %vm308_vm11, %v470_v50, %v472_v49 }
 0x1dd   : > { %v474_v53 = vpop.permute.xlu2 %473  ;;  %1069 = vmatpush.msk.msra.mxu2 %vm1556_vm5, %v475_v52 }
 0x1de   : > { %1070 = vmatmul.msk.f32.vlgmr.msra.gmra.mxu2 %vm415_vm12, %v567_v51  ;;  %v476_v54 = vsel %vm308_vm11, %v472_v49, %v474_v53 }
 0x1df   : > { %1076 = vmatpush.msk.msra.mxu3 %vm1560_vm6, %v476_v54  ;;  %v652_v6 = vpop.permute.xlu1 %651 }
 0x1e0   : > { %1077 = vmatmul.msk.f32.vlgmr.msra.gmra.mxu3 %vm415_vm12, %v567_v51 }
 0x1e3   : > { %v572_v55 = vpop.permute.xlu0 %571 }
 0x1e7   : > { %v640_v11 = vpop.permute.xlu1 %639 }
 0x1eb   : > { %v720_v4 = vpop.permute.xlu0 %719 }
 0x1f3   : > { %v686_v9 = vpop.permute.xlu0 %685 }
 0x1fb   : > { %v674_v14 = vpop.permute.xlu0 %673 }
 0x261   : > { %v594_v56 = vpop.f32.mrf.mxu2 }
 0x262   : > { %v595_v57 = vadd.f32 %v594_v56, %v572_v55 }
 0x263   : > { %v614_v58 = vpop.f32.mrf.mxu3 }
 0x264   : > { %v1685_v59 = vadd.f32 %v595_v57, %v1488_v1  ;;  %v615_v60 = vadd.f32 %v614_v58, %v572_v55 }
 0x266   : > { %v1688_v61 = vadd.f32 %v615_v60, %v1490_v2  ;;  %693 = vrot.lane.b32.xlu1 %v1685_v59, %s1367_s23  ;;  %v1214_v2 = vpack.i.bf16 %v1685_v59, %v1366_v0 }
 0x268   : > { %655 = vrot.lane.b32.xlu0 %v1688_v61, %s1371_s11  ;;  %695 = vrot.lane.b32.xlu2 %v1688_v61, %s1367_s23  ;;  %v1209_v1 = vpack.i.bf16 %v1688_v61, %v1685_v59 }
 0x26e   : > { %681 = vrot.lane.b32.xlu1 %v1685_v59, %s1369_s9 }
 0x270   : > { %643 = vrot.lane.b32.xlu0 %v1688_v61, %s1372_s12  ;;  %1210 = vrot.lane.b32.xlu2 %v1209_v1, %s1368_s26 }
 0x276   : > { %669 = vrot.lane.b32.xlu1 %v1685_v59, %s1370_s10 }
 0x278   : > { %627 = vrot.lane.b32.xlu0 %v1366_v0, %s1374_s14  ;;  %683 = vrot.lane.b32.xlu2 %v1688_v61, %s1369_s9 }
 0x27e   : > { %1215 = vrot.lane.b32.xlu1 %v1214_v2, %s1373_s13 }
 0x280   : > { %731 = vperm.xlu0 %1208, %v1078_v62   ;;  %671 = vrot.lane.b32.xlu2 %v1688_v61, %s1370_s10 }
 0x286   : > { %629 = vrot.lane.b32.xlu1 %v1685_v59, %s1374_s14 }
 0x288   : > { %653 = vrot.lane.b32.xlu2 %v1685_v59, %s1371_s11  ;;  %857 = vrot.lane.b32.xlu0 %v1366_v0, %s1367_s23 }
 0x290   : > { %641 = vrot.lane.b32.xlu2 %v1685_v59, %s1372_s12  ;;  %811 = vrot.lane.b32.xlu0 %v1366_v0, %s1371_s11 }
 0x298   : > { %709 = vrot.lane.b32.xlu2 %v1688_v61, %s1373_s13  ;;  %799 = vrot.lane.b32.xlu0 %v1366_v0, %s1372_s12 }
 0x2a0   : > { %631 = vrot.lane.b32.xlu2 %v1688_v61, %s1374_s14 }
 0x2a8   : > { %879 = vrot.lane.b32.xlu2 %v1366_v0, %s1368_s26 }
 0x2b0   : > { %845 = vrot.lane.b32.xlu2 %v1366_v0, %s1369_s9 }
 0x2b8   : > { %833 = vrot.lane.b32.xlu2 %v1366_v0, %s1370_s10 }
 0x2c2   : > { %v696_v3 = vpop.permute.xlu2 %695 }
 0x2c3   : > { %v700_v5 = vsel %vm379_vm0, %v696_v3, %v698_v63 }
 0x2c4   : > { %1086 = vmatpush.msk.msrb.mxu1 %vm1544_vm2, %v700_v5 }
 0x2ca   : > { %v1211_v7 = vpop.permute.xlu2 %1210 }
 0x2cb   : > { %v1213_v8 = vunpack.i.h.bf16 %v1211_v7  ;;  %v1212_v15 = vunpack.i.l.bf16 %v1211_v7 }
 0x2cd   : > { %v722_v10 = vsel %vm403_vm3, %v1213_v8, %v720_v4  ;;  %v721_v21 = vsel %vm403_vm3, %v1212_v15, %v1213_v8 }
 0x2ce   : > { %765 = vmatpush.msrb.mxu1 %v722_v10 }
 0x2d2   : > { %v684_v12 = vpop.permute.xlu2 %683 }
 0x2d3   : > { %v688_v13 = vsel %vm366_vm4, %v684_v12, %v686_v9 }
 0x2d4   : > { %1087 = vmatpush.msk.msrb.mxu1 %vm1560_vm6, %v688_v13 }
 0x2d8   : > { %v694_v16 = vpop.permute.xlu1 %693 }
 0x2d9   : > { %v699_v17 = vsel %vm379_vm0, %v694_v16, %v696_v3 }
 0x2da   : > { %v672_v20 = vpop.permute.xlu2 %671  ;;  %1079 = vmatpush.msk.msrb.mxu0 %vm1540_vm1, %v699_v17  ;;  %v656_v23 = vpop.permute.xlu0 %655 }
 0x2db   : > { %v676_v22 = vsel %vm353_vm7, %v672_v20, %v674_v14 }
 0x2dc   : > { %745 = vmatpush.msrb.mxu0 %v721_v21  ;;  %1088 = vmatpush.msk.msrb.mxu1 %vm1544_vm2, %v676_v22  ;;  %v1093_v22 = vld [vmem:[%s1884_s4 + $0x8] sm:$0xff] }
 0x2de   : > { %768 = vmatpush.msrb.mxu1 %v1688_v61 }
 0x2e0   : > { %v682_v24 = vpop.permute.xlu1 %681 }
 0x2e1   : > { %v687_v25 = vsel %vm366_vm4, %v682_v24, %v684_v12 }
 0x2e2   : > { %v654_v26 = vpop.permute.xlu2 %653  ;;  %1080 = vmatpush.msk.msrb.mxu0 %vm1556_vm5, %v687_v25  ;;  %v644_v32 = vpop.permute.xlu0 %643 }
 0x2e3   : > { %v658_v29 = vsel %vm334_vm8, %v654_v26, %v656_v23  ;;  %v657_v35 = vsel %vm334_vm8, %v652_v6, %v654_v26 }
 0x2e4   : > { %1089 = vmatpush.msk.msrb.mxu1 %vm1560_vm6, %v658_v29 }
 0x2e8   : > { %v670_v30 = vpop.permute.xlu1 %669 }
 0x2e9   : > { %v675_v31 = vsel %vm353_vm7, %v670_v30, %v672_v20 }
 0x2ea   : > { %v642_v33 = vpop.permute.xlu2 %641  ;;  %1081 = vmatpush.msk.msrb.mxu0 %vm1540_vm1, %v675_v31  ;;  %v628_v43 = vpop.permute.xlu0 %627 }
 0x2eb   : > { %v646_v34 = vsel %vm321_vm9, %v642_v33, %v644_v32  ;;  %v645_v36 = vsel %vm321_vm9, %v640_v11, %v642_v33 }
 0x2ec   : > { %748 = vmatpush.msrb.mxu0 %v1685_v59  ;;  %1090 = vmatpush.msk.msrb.mxu1 %vm1544_vm2, %v646_v34 }
 0x2ee   : > { %1082 = vmatpush.msk.msrb.mxu0 %vm1556_vm5, %v657_v35 }
 0x2f0   : > { %1083 = vmatpush.msk.msrb.mxu0 %vm1540_vm1, %v645_v36  ;;  %v1216_v37 = vpop.permute.xlu1 %1215 }
 0x2f1   : > { %v1218_v38 = vunpack.i.h.bf16 %v1216_v37  ;;  %v1217_v39 = vunpack.i.l.bf16 %v1216_v37 }
 0x2f2   : > { %v710_v40 = vpop.permute.xlu2 %709  ;;  %v732_v49 = vpop.permute.xlu0 %731 }
 0x2f3   : > { %v711_v41 = vsel %vm392_vm10, %v1217_v39, %v1218_v38  ;;  %v712_v42 = vsel %vm392_vm10, %v1218_v38, %v710_v40  ;;  %v886_v38 = vld [vmem:[#allocation6 + $0x8] sm:$0xff] }
 0x2f4   : > { %751 = vmatpush.msrb.mxu0 %v711_v41  ;;  %771 = vmatpush.msrb.mxu1 %v712_v42 }
 0x2f8   : > { %v630_v44 = vpop.permute.xlu1 %629 }
 0x2f9   : > { %v633_v46 = vsel %vm308_vm11, %v628_v43, %v630_v44 }
 0x2fa   : > { %v632_v47 = vpop.permute.xlu2 %631  ;;  %1084 = vmatpush.msk.msrb.mxu0 %vm1556_vm5, %v633_v46  ;;  %v858_v2 = vpop.permute.xlu0 %857 }
 0x2fb   : > { %1085 = vmatmul.msk.f32.vlgmr.msrb.gmra.mxu0 %vm415_vm12, %v726_v45  ;;  %v634_v48 = vsel %vm308_vm11, %v630_v44, %v632_v47 }
 0x2fc   : > { %1091 = vmatpush.msk.msrb.mxu1 %vm1560_vm6, %v634_v48 }
 0x2fd   : > { %1092 = vmatmul.msk.f32.vlgmr.msrb.gmra.mxu1 %vm415_vm12, %v726_v45 }
 0x302   : > { %v880_v58 = vpop.permute.xlu2 %879  ;;  %v812_v3 = vpop.permute.xlu0 %811 }
 0x30a   : > { %v846_v60 = vpop.permute.xlu2 %845  ;;  %v800_v5 = vpop.permute.xlu0 %799 }
 0x312   : > { %v834_v1 = vpop.permute.xlu2 %833 }
 0x378   : > { %v754_v50 = vpop.f32.mrf.mxu0 }
 0x379   : > { %v755_v51 = vadd.f32 %v754_v50, %v732_v49 }
 0x37a   : > { %v774_v52 = vpop.f32.mrf.mxu1 }
 0x37b   : > { %v777_v53 = vmax.f32 %v755_v51, 0.0  ;;  %v775_v54 = vadd.f32 %v774_v52, %v732_v49 }
 0x37d   : > { %v778_v55 = vmax.f32 %v775_v54, 0.0  ;;  %841 = vrot.lane.b32.xlu0 %v777_v53, %s1369_s9  ;;  %853 = vrot.lane.b32.xlu1 %v777_v53, %s1367_s23  ;;  %v1224_v57 = vpack.i.bf16 %v777_v53, %v1366_v0 }
 0x37f   : > { %855 = vrot.lane.b32.xlu2 %v778_v55, %s1367_s23  ;;  %v1219_v56 = vpack.i.bf16 %v778_v55, %v777_v53 }
 0x385   : > { %829 = vrot.lane.b32.xlu0 %v777_v53, %s1370_s10  ;;  %1220 = vrot.lane.b32.xlu1 %v1219_v56, %s1368_s26 }
 0x387   : > { %815 = vrot.lane.b32.xlu2 %v778_v55, %s1371_s11 }
 0x38d   : > { %1225 = vrot.lane.b32.xlu0 %v1224_v57, %s1373_s13  ;;  %843 = vrot.lane.b32.xlu1 %v778_v55, %s1369_s9  ;;  %s251_s9 = scalar_lea.vmem [#allocation8], %s1047_s8 }
 0x38f   : > { %803 = vrot.lane.b32.xlu2 %v778_v55, %s1372_s12 }
 0x395   : > { %789 = vrot.lane.b32.xlu0 %v777_v53, %s1374_s14  ;;  %831 = vrot.lane.b32.xlu1 %v778_v55, %s1370_s10  ;;  %s1114_s10 = sshll.u32 %s1427_s22, 4 }
 0x397   : > { %787 = vrot.lane.b32.xlu2 %v1366_v0, %s1374_s14 }
 0x39d   : > { %813 = vrot.lane.b32.xlu1 %v777_v53, %s1371_s11 }
 0x39f   : > { %891 = vperm.xlu2 %1229, %v1093_v22  }
 0x3a5   : > { %801 = vrot.lane.b32.xlu1 %v777_v53, %s1372_s12 }
 0x3ad   : > { %869 = vrot.lane.b32.xlu1 %v778_v55, %s1373_s13  ;;  %s953_s13 = scalar_lea.hbm %s1885_s5, %s1114_s10 }
 0x3ae   : > { %s957_s15 = sshll.u32 %s953_s13, 4  ;;  %s958_s15 = int_to_ptr.hbm [resolvable:$true] %s957_s15 }
 0x3af   : > { %s1304_s17 = sshra.s32 %s958_s15, 4  ;;  %s1305_s17 = int_to_ptr.hbm [resolvable:$true] %s1304_s17 }
 0x3b0   : > { %s1306_s25 = scalar_lea.hbm %s1305_s17, 16  ;;  %p1311_p3 = scmp.lt.s32.totalorder %s1305_s17, %s1885_s5 }
 0x3b1   : > { %p1307_p0 = scmp.ne.s32.totalorder %s1305_s17, %s1306_s25  ;;  %p1312_p4 = scmp.lt.s32.totalorder %s1310_s6, %s1306_s25 }
 0x3b3   : > { %p1308_p1 = pnand %p1307_p0, %p1444_p5  ;;  %p1313_p7 = por %p1312_p4, %p1311_p3 }
 0x3b5   : > { %791 = vrot.lane.b32.xlu1 %v778_v55, %s1374_s14  ;;  %s955_s14 = sshll.u32 %s251_s9, 4  ;;  %p1309_p2 = pneg %p1308_p1  ;;  %s956_s14 = int_to_ptr.vmem [resolvable:$true] %s955_s14 }
 0x3b7   : > { %p1314_p8 = pnand %p1313_p7, %p1309_p2 }
 0x3d9   : > { %v856_v62 = vpop.permute.xlu2 %855 }
 0x3da   : > { %v860_v63 = vsel %vm379_vm0, %v856_v62, %v858_v2 }
 0x3db   : > { %1101 = vmatpush.msk.msrb.mxu3 %vm1544_vm2, %v860_v63 }
 0x3e1   : > { %v816_v16 = vpop.permute.xlu2 %815 }
 0x3e9   : > { %v804_v29 = vpop.permute.xlu2 %803 }
 0x3ef   : > { %v854_v0 = vpop.permute.xlu1 %853  ;;  %v842_v11 = vpop.permute.xlu0 %841 }
 0x3f0   : > { %v859_v4 = vsel %vm379_vm0, %v854_v0, %v856_v62 }
 0x3f1   : > { %1094 = vmatpush.msk.msrb.mxu2 %vm1540_vm1, %v859_v4  ;;  %v788_v35 = vpop.permute.xlu2 %787 }
 0x3f7   : > { %v1221_v6 = vpop.permute.xlu1 %1220  ;;  %v830_v15 = vpop.permute.xlu0 %829 }
 0x3f8   : > { %v1223_v7 = vunpack.i.h.bf16 %v1221_v6  ;;  %v1222_v8 = vunpack.i.l.bf16 %v1221_v6 }
 0x3f9   : > { %v892_v42 = vpop.permute.xlu2 %891 }
 0x3fa   : > { %v881_v9 = vsel %vm403_vm3, %v1222_v8, %v1223_v7  ;;  %v882_v10 = vsel %vm403_vm3, %v1223_v7, %v880_v58 }
 0x3fb   : > { %905 = vmatpush.msrb.mxu2 %v881_v9  ;;  %925 = vmatpush.msrb.mxu3 %v882_v10 }
 0x3ff   : > { %v844_v12 = vpop.permute.xlu1 %843  ;;  %v1226_v23 = vpop.permute.xlu0 %1225 }
 0x400   : > { %v847_v13 = vsel %vm366_vm4, %v842_v11, %v844_v12  ;;  %v848_v14 = vsel %vm366_vm4, %v844_v12, %v846_v60  ;;  %v1228_v30 = vunpack.i.h.bf16 %v1226_v23  ;;  %v1227_v31 = vunpack.i.l.bf16 %v1226_v23 }
 0x401   : > { %1095 = vmatpush.msk.msrb.mxu2 %vm1556_vm5, %v847_v13  ;;  %1102 = vmatpush.msk.msrb.mxu3 %vm1560_vm6, %v848_v14 }
 0x402   : > { %v871_v37 = vsel %vm392_vm10, %v1227_v31, %v1228_v30 }
 0x407   : > { %v832_v17 = vpop.permute.xlu1 %831  ;;  %v790_v36 = vpop.permute.xlu0 %789 }
 0x408   : > { %v835_v20 = vsel %vm353_vm7, %v830_v15, %v832_v17  ;;  %v836_v21 = vsel %vm353_vm7, %v832_v17, %v834_v1  ;;  %v793_v39 = vsel %vm308_vm11, %v788_v35, %v790_v36 }
 0x409   : > { %1096 = vmatpush.msk.msrb.mxu2 %vm1540_vm1, %v835_v20  ;;  %1103 = vmatpush.msk.msrb.mxu3 %vm1544_vm2, %v836_v21 }
 0x40b   : > { %908 = vmatpush.msrb.mxu2 %v777_v53  ;;  %928 = vmatpush.msrb.mxu3 %v778_v55 }
 0x40f   : > { %v814_v24 = vpop.permute.xlu1 %813 }
 0x410   : > { %v817_v25 = vsel %vm334_vm8, %v812_v3, %v814_v24  ;;  %v818_v26 = vsel %vm334_vm8, %v814_v24, %v816_v16 }
 0x411   : > { %1097 = vmatpush.msk.msrb.mxu2 %vm1556_vm5, %v817_v25  ;;  %1104 = vmatpush.msk.msrb.mxu3 %vm1560_vm6, %v818_v26 }
 0x417   : > { %v802_v32 = vpop.permute.xlu1 %801 }
 0x418   : > { %v805_v33 = vsel %vm321_vm9, %v800_v5, %v802_v32  ;;  %v806_v34 = vsel %vm321_vm9, %v802_v32, %v804_v29 }
 0x419   : > { %1098 = vmatpush.msk.msrb.mxu2 %vm1540_vm1, %v805_v33  ;;  %1105 = vmatpush.msk.msrb.mxu3 %vm1544_vm2, %v806_v34 }
 0x41b   : > { %911 = vmatpush.msrb.mxu2 %v871_v37 }
 0x41d   : > { %1099 = vmatpush.msk.msrb.mxu2 %vm1556_vm5, %v793_v39 }
 0x41e   : > { %1100 = vmatmul.msk.f32.vlgmr.msrb.gmra.mxu2 %vm415_vm12, %v886_v38 }
 0x41f   : > { %v870_v40 = vpop.permute.xlu1 %869 }
 0x420   : > { %v872_v18 = vsel %vm392_vm10, %v1228_v30, %v870_v40 }
 0x421   : > { %931 = vmatpush.msrb.mxu3 %v872_v18 }
 0x427   : > { %v792_v41 = vpop.permute.xlu1 %791 }
 0x428   : > { %v794_v19 = vsel %vm308_vm11, %v790_v36, %v792_v41 }
 0x429   : > { %1106 = vmatpush.msk.msrb.mxu3 %vm1560_vm6, %v794_v19 }
 0x42a   : > { %1107 = vmatmul.msk.f32.vlgmr.msrb.gmra.mxu3 %vm415_vm12, %v886_v38 }
 0x4a1   : > { %v914_v27 = vpop.f32.mrf.mxu2 }
 0x4a2   : > { %v915_v43 = vadd.f32 %v914_v27, %v892_v42 }
 0x4a4   : > { %v937_v44 = vadd.f32 %v915_v43, %v1685_v59 }
 0x4a6   : > { %939 = vst [vmem:[%s251_s9] sm:$0xff] %v937_v44 }
 0x4ad   : > { %v934_v45 = vpop.f32.mrf.mxu3 }
 0x4ae   : > { %v935_v28 = vadd.f32 %v934_v45, %v892_v42 }
 0x4b0   : > { %v938_v46 = vadd.f32 %v935_v28, %v1688_v61 }
 0x4b2   : > { %940 = vst [vmem:[%s251_s9 + $0x8] sm:$0xff] %v938_v46 }
 0x4b3   : > { %1317 = shalt.err (!%p1314_p8)
}
 0x4b4   : > { %1123 = dma.vmem_to_hbm [thread:$0]  (%p1444_p5), %s956_s14, 256, %s958_s15, %s942_s16  }
 0x4b5 PF: > { %p1140_p9 = scmp.ge.s32.totalorder %s1360_s21, 2  ;;  %s969_s7 = sand.u32 1, %s1348_s18  }
 0x4b6   : > { %s970_s8 = scalar_lea.sflag [#allocation5], %s969_s7 }
 0x4b7   : > { %p1133_p10 = pnand %p1140_p9, %p1448_p6 }
 0x4b9   : > { %p1134_p11 = pneg %p1133_p10 }
 0x4bb   : > { %1343 = dma.done.wait (%p1134_p11), %s970_s8, 256  }
 0x4bc   : > { %1345 = vsyncadd (%p1134_p11), %s970_s8, 4294967040  ;;  %p17_p12 = scmp.ge.s32.totalorder %s1431_s24, 4   ;;  %s1897_s18 = smov %s1352_s19 }
 0x4bd   : > { %s1898_s19 = smov %s1356_s20  ;;  %s1899_s20 = smov %s1442_s27 }
 0x4be   : > { %s1900_s21 = smov %s1431_s24  ;;  %19 = sbr.rel (!%p17_p12) target bundleno = 5 (0x5), region = 88 }
 0x4c3   :  { %976 = vsyncpa [#allocation4], 1 }
 0x4c4   :  { %978 = vsyncpa [#allocation4 + $0x1], 1 }
 0x4c5   :  { %979 = vsyncpa [#allocation7], 1 }
 0x4c6   :  { %980 = vsyncpa [#allocation5], 1 }
 0x4c7   :  { %982 = vsyncpa [#allocation5 + $0x1], 1 }

</bundles_post_ra>
